<compile_context>
chip_gen: v7x
topology: tpu7x:2x2x1
jax: 0.10.0
libtpu: 0.0.40
codegen_flags: <defaults>
</compile_context>

<pallas_src>
import functools

import jax
import jax.numpy as jnp
import numpy as np
from jax.experimental import pallas as pl
from jax.experimental.pallas import tpu as pltpu


_SINGLE_BLOCK_MAX = 512     # below this, use one full-array block (grid of 1)
_JNP_FALLBACK_MAX = 2048    # below this, the PyTorch-layout wrapper skips Pallas


def mlp_kernel(xt_ref, w1_ref, w2_ref, w3_ref, b_ref, ot_ref):
    """All activations are [features, TILE_B]: batch on the lane axis."""
    xt = xt_ref[...]                                  # [n_in, TILE_B]
    b = b_ref[...]                                    # [10, 3] packed biases
    cdt = xt.dtype                                    # MXU operand dtype
    n1 = w1_ref.shape[0]                              # 10
    n2 = w2_ref.shape[0]                              # 8
    n3 = w3_ref.shape[0]                              # 3

    # hidden1: Linear(n_in, 10) + ReLU               -> [10, TILE_B]
    h1 = jnp.dot(w1_ref[...], xt, preferred_element_type=jnp.float32)
    h1 = jnp.maximum(h1 + b[:n1, 0:1], 0.0).astype(cdt)

    # hidden2: Linear(10, 8) + ReLU                  -> [8, TILE_B]
    h2 = jnp.dot(w2_ref[...], h1, preferred_element_type=jnp.float32)
    h2 = jnp.maximum(h2 + b[:n2, 1:2], 0.0).astype(cdt)

    # hidden3: Linear(8, 3) + Softmax over classes (class axis = axis 0 here)
    logits = (jnp.dot(w3_ref[...], h2, preferred_element_type=jnp.float32)
              + b[:n3, 2:3])                          # [3, TILE_B]
    m = jnp.max(logits, axis=0, keepdims=True)
    e = jnp.exp(logits - m)
    s = jnp.sum(e, axis=0, keepdims=True)
    # EUP reciprocal (otherwise-idle slot) + one Newton step for f32 accuracy.
    inv = pl.reciprocal(s, approx=True)
    inv = inv * (2.0 - s * inv)
    ot_ref[...] = (e * inv).astype(ot_ref.dtype)      # [3, TILE_B], lane-dense


def _pick_tile(batch, tile_b):
    """Batch (lane-axis) tile width.

    Small batches -> one full-array block (always layout-legal).  Otherwise a
    multiple of 128, sized so the grid has >= 8 (and preferably an even number
    of) steps so v7x's two TensorCores both get several pipelined iterations.
    """
    if batch <= _SINGLE_BLOCK_MAX:
        return batch
    lanes = pl.cdiv(batch, 128)                 # batch in 128-lane units
    cap = max(1, min(tile_b, 65536) // 128)     # user cap / VMEM-safe ceiling
    steps = pl.cdiv(lanes, cap)
    steps = max(steps, min(8, lanes))           # >= 8 steps when batch allows
    if steps > 1 and steps % 2:
        steps += 1                              # even split across 2 TCs (v7x)
    steps = min(steps, lanes)                   # never narrower than 128 lanes
    return pl.cdiv(lanes, steps) * 128


@functools.partial(jax.jit, static_argnames=("tile_b", "compute_dtype"))
def mlp_forward_t(xt, params, *, tile_b=32768, compute_dtype=jnp.float32):
    """Primary (transpose-free) contract.

    xt: [n_inputs, B] feature-major activations  ->  probs [3, B] class-major.
    No wrapper-side transposes / pads: the only HBM traffic is what the kernel
    itself streams.  `compute_dtype=jnp.bfloat16` halves streamed-input bytes
    on v6e/v7x (keep f32 on v5e and for 1e-5-tolerance use).
    """
    w1, b1, w2, b2, w3, b3 = params
    n_in, batch = xt.shape
    n_h1, n_h2, n_out = w1.shape[1], w2.shape[1], w3.shape[1]

    # Weights pre-transposed to [out, in] (tiny; stays VMEM-resident).
    w1t = w1.T.astype(compute_dtype)
    w2t = w2.T.astype(compute_dtype)
    w3t = w3.T.astype(compute_dtype)
    xt = xt.astype(compute_dtype)

    # Biases packed into one small resident operand: column j = layer-j bias.
    b_pack = jnp.zeros((n_h1, 3), jnp.float32)
    b_pack = (b_pack.at[:n_h1, 0].set(b1)
                    .at[:n_h2, 1].set(b2)
                    .at[:n_out, 2].set(b3))

    tile = _pick_tile(batch, tile_b)
    grid = (pl.cdiv(batch, tile),)              # ragged last block is masked
    resident = lambda shape: pl.BlockSpec(shape, lambda i: (0, 0))

    return pl.pallas_call(
        mlp_kernel,
        out_shape=jax.ShapeDtypeStruct((n_out, batch), jnp.float32),
        grid=grid,
        in_specs=[
            pl.BlockSpec((n_in, tile), lambda i: (0, i)),   # streamed input
            resident(w1t.shape),                            # resident params
            resident(w2t.shape),
            resident(w3t.shape),
            resident(b_pack.shape),
        ],
        out_specs=pl.BlockSpec((n_out, tile), lambda i: (0, i)),
        compiler_params=pltpu.CompilerParams(
            dimension_semantics=("parallel",),   # shard batch over v7x's 2 TCs
        ),
    )(xt, w1t, w2t, w3t, b_pack)


def mlp_forward(x, params, *, tile_b=32768, compute_dtype=jnp.float32,
                prefer_pallas=None):
    """PyTorch-layout compatibility API: x [B, n_inputs] -> probs [B, 3].

    This path pays two boundary transposes (x.T in / out.T back); callers that
    can keep activations feature-major should use `mlp_forward_t`.  For small
    batches the fixed Pallas + layout cost dominates, so it falls back to the
    plain fused-XLA reference unless `prefer_pallas=True`.
    """
    batch = x.shape[0]
    use_pallas = prefer_pallas if prefer_pallas is not None else (
        batch >= _JNP_FALLBACK_MAX)
    if not use_pallas:
        return mlp_reference(x, params)
    out_t = mlp_forward_t(x.T, params, tile_b=tile_b,
                          compute_dtype=compute_dtype)
    return out_t.T


def init_params(key, n_inputs):
    """Deterministic init mirroring the PyTorch module's __init__ semantics."""
    k = jax.random.split(key, 6)

    def kaiming_uniform(key, fan_in, fan_out):
        # gain=sqrt(2) for relu -> bound = sqrt(6 / fan_in)
        bound = np.sqrt(6.0 / fan_in)
        return jax.random.uniform(key, (fan_in, fan_out), jnp.float32, -bound, bound)

    def xavier_uniform(key, fan_in, fan_out):
        bound = np.sqrt(6.0 / (fan_in + fan_out))
        return jax.random.uniform(key, (fan_in, fan_out), jnp.float32, -bound, bound)

    def linear_bias(key, fan_in, fan_out):
        # PyTorch default Linear bias init: U(-1/sqrt(fan_in), 1/sqrt(fan_in))
        bound = 1.0 / np.sqrt(fan_in)
        return jax.random.uniform(key, (fan_out,), jnp.float32, -bound, bound)

    w1 = kaiming_uniform(k[0], n_inputs, 10)
    b1 = linear_bias(k[1], n_inputs, 10)
    w2 = kaiming_uniform(k[2], 10, 8)
    b2 = linear_bias(k[3], 10, 8)
    w3 = xavier_uniform(k[4], 8, 3)
    b3 = linear_bias(k[5], 8, 3)
    return (w1, b1, w2, b2, w3, b3)


def mlp_reference(x, params):
    w1, b1, w2, b2, w3, b3 = params
    h1 = jnp.maximum(x @ w1 + b1, 0.0)
    h2 = jnp.maximum(h1 @ w2 + b2, 0.0)
    return jax.nn.softmax(h2 @ w3 + b3, axis=1)


if __name__ == "__main__":
    n_inputs = 4  # Iris features

    key = jax.random.PRNGKey(0)
    kx, kp, kx2 = jax.random.split(key, 3)
    params = init_params(kp, n_inputs)

    # 1) Tiny batch through the PyTorch-layout API, Pallas forced:
    #    single full-array block (grid of 1).
    x_small = jax.random.normal(kx, (8, n_inputs), dtype=jnp.float32)
    out_small = jax.block_until_ready(
        mlp_forward(x_small, params, prefer_pallas=True))
    np.testing.assert_allclose(np.asarray(out_small),
                               np.asarray(mlp_reference(x_small, params)),
                               rtol=1e-5, atol=1e-5)
    np.testing.assert_allclose(np.asarray(out_small).sum(axis=1),
                               np.ones(x_small.shape[0]), rtol=1e-5, atol=1e-5)

    # 2) Moderate batch through the primary, transpose-free feature-major
    #    contract: 8-step "parallel" grid (exercises pipelining / megacore).
    B = 1024
    x_big = jax.random.normal(kx2, (B, n_inputs), dtype=jnp.float32)
    ref_big = mlp_reference(x_big, params)
    out_t = jax.block_until_ready(
        mlp_forward_t(jnp.asarray(x_big.T), params, tile_b=128))
    np.testing.assert_allclose(np.asarray(out_t), np.asarray(ref_big).T,
                               rtol=1e-5, atol=1e-5)
    np.testing.assert_allclose(np.asarray(out_t).sum(axis=0),
                               np.ones(B), rtol=1e-5, atol=1e-5)

    # 3) Auto path at this batch size uses the fused-XLA fallback (no Pallas,
    #    no layout plumbing) and must still match.
    out_auto = jax.block_until_ready(mlp_forward(x_big, params))
    np.testing.assert_allclose(np.asarray(out_auto), np.asarray(ref_big),
                               rtol=1e-5, atol=1e-5)

    print("KERNEL_OK")
</pallas_src>

<mosaic_0001>
module attributes {stable_mosaic.version = 11 : i64} {
  func.func @mlp_kernel(%arg0: i32, %arg1: memref<4x8xf32, #tpu.memory_space<vmem>>, %arg2: memref<10x4xf32, #tpu.memory_space<vmem>>, %arg3: memref<8x10xf32, #tpu.memory_space<vmem>>, %arg4: memref<3x8xf32, #tpu.memory_space<vmem>>, %arg5: memref<10x3xf32, #tpu.memory_space<vmem>>, %arg6: memref<3x8xf32, #tpu.memory_space<vmem>>) attributes {dimension_semantics = [#tpu.dimension_semantics<parallel>], iteration_bounds = array<i64: 1>, scalar_prefetch = 0 : i64, scratch_operands = 0 : i64, tpu.core_type = #tpu.core_type<tc>, window_params = [{transform_indices = @transform_0, window_bounds = array<i64: 4, 8>}, {pipeline_mode = #tpu.pipeline_mode<synchronous>, transform_indices = @transform_1, window_bounds = array<i64: 10, 4>}, {pipeline_mode = #tpu.pipeline_mode<synchronous>, transform_indices = @transform_2, window_bounds = array<i64: 8, 10>}, {pipeline_mode = #tpu.pipeline_mode<synchronous>, transform_indices = @transform_3, window_bounds = array<i64: 3, 8>}, {pipeline_mode = #tpu.pipeline_mode<synchronous>, transform_indices = @transform_4, window_bounds = array<i64: 10, 3>}, {transform_indices = @transform_5, window_bounds = array<i64: 3, 8>}]} {
    %c0 = arith.constant 0 : index
    %c0_0 = arith.constant 0 : index
    %0 = vector.load %arg1[%c0, %c0_0] : memref<4x8xf32, #tpu.memory_space<vmem>>, vector<4x8xf32>
    %c0_1 = arith.constant 0 : index
    %c0_2 = arith.constant 0 : index
    %1 = vector.load %arg5[%c0_1, %c0_2] : memref<10x3xf32, #tpu.memory_space<vmem>>, vector<10x3xf32>
    %c0_3 = arith.constant 0 : index
    %c0_4 = arith.constant 0 : index
    %2 = vector.load %arg2[%c0_3, %c0_4] : memref<10x4xf32, #tpu.memory_space<vmem>>, vector<10x4xf32>
    %cst = arith.constant dense<0.000000e+00> : vector<10x8xf32>
    %3 = tpu.matmul %2, %0, %cst {dimension_numbers = #tpu.dot_dimension_numbers<[1], [0], [0], [1], [0, 0, 1, 1], [], []>} : vector<10x4xf32>, vector<4x8xf32>, vector<10x8xf32> -> vector<10x8xf32>
    %4 = vector.extract_strided_slice %1 {offsets = [0, 0], sizes = [10, 1], strides = [1, 1]} : vector<10x3xf32> to vector<10x1xf32>
    %5 = vector.broadcast %4 : vector<10x1xf32> to vector<10x8xf32>
    %6 = arith.addf %3, %5 : vector<10x8xf32>
    %cst_5 = arith.constant 0.000000e+00 : f32
    %7 = vector.broadcast %cst_5 : f32 to vector<10x8xf32>
    %8 = arith.maximumf %6, %7 : vector<10x8xf32>
    %c0_6 = arith.constant 0 : index
    %c0_7 = arith.constant 0 : index
    %9 = vector.load %arg3[%c0_6, %c0_7] : memref<8x10xf32, #tpu.memory_space<vmem>>, vector<8x10xf32>
    %cst_8 = arith.constant dense<0.000000e+00> : vector<8x8xf32>
    %10 = tpu.matmul %9, %8, %cst_8 {dimension_numbers = #tpu.dot_dimension_numbers<[1], [0], [0], [1], [0, 0, 1, 1], [], []>} : vector<8x10xf32>, vector<10x8xf32>, vector<8x8xf32> -> vector<8x8xf32>
    %11 = vector.extract_strided_slice %1 {offsets = [0, 1], sizes = [8, 1], strides = [1, 1]} : vector<10x3xf32> to vector<8x1xf32>
    %12 = vector.broadcast %11 : vector<8x1xf32> to vector<8x8xf32>
    %13 = arith.addf %10, %12 : vector<8x8xf32>
    %cst_9 = arith.constant 0.000000e+00 : f32
    %14 = vector.broadcast %cst_9 : f32 to vector<8x8xf32>
    %15 = arith.maximumf %13, %14 : vector<8x8xf32>
    %c0_10 = arith.constant 0 : index
    %c0_11 = arith.constant 0 : index
    %16 = vector.load %arg4[%c0_10, %c0_11] : memref<3x8xf32, #tpu.memory_space<vmem>>, vector<3x8xf32>
    %cst_12 = arith.constant dense<0.000000e+00> : vector<3x8xf32>
    %17 = tpu.matmul %16, %15, %cst_12 {dimension_numbers = #tpu.dot_dimension_numbers<[1], [0], [0], [1], [0, 0, 1, 1], [], []>} : vector<3x8xf32>, vector<8x8xf32>, vector<3x8xf32> -> vector<3x8xf32>
    %18 = vector.extract_strided_slice %1 {offsets = [0, 2], sizes = [3, 1], strides = [1, 1]} : vector<10x3xf32> to vector<3x1xf32>
    %19 = vector.broadcast %18 : vector<3x1xf32> to vector<3x8xf32>
    %20 = arith.addf %17, %19 : vector<3x8xf32>
    %cst_13 = arith.constant dense<0xFF800000> : vector<8xf32>
    %21 = vector.multi_reduction <maximumf>, %20, %cst_13 [0] : vector<3x8xf32> to vector<8xf32>
    %22 = vector.shape_cast %21 : vector<8xf32> to vector<1x8xf32>
    %23 = vector.broadcast %22 : vector<1x8xf32> to vector<3x8xf32>
    %24 = arith.subf %20, %23 : vector<3x8xf32>
    %25 = math.exp %24 : vector<3x8xf32>
    %cst_14 = arith.constant dense<0.000000e+00> : vector<8xf32>
    %26 = vector.multi_reduction <add>, %25, %cst_14 [0] : vector<3x8xf32> to vector<8xf32>
    %27 = vector.shape_cast %26 : vector<8xf32> to vector<1x8xf32>
    %28 = tpu.reciprocal %27 {approx = true} : vector<1x8xf32> -> vector<1x8xf32>
    %29 = arith.mulf %27, %28 : vector<1x8xf32>
    %cst_15 = arith.constant 2.000000e+00 : f32
    %30 = vector.broadcast %cst_15 : f32 to vector<1x8xf32>
    %31 = arith.subf %30, %29 : vector<1x8xf32>
    %32 = arith.mulf %28, %31 : vector<1x8xf32>
    %33 = vector.broadcast %32 : vector<1x8xf32> to vector<3x8xf32>
    %34 = arith.mulf %25, %33 : vector<3x8xf32>
    %c0_16 = arith.constant 0 : index
    %c0_17 = arith.constant 0 : index
    %35 = vector.load %arg6[%c0_16, %c0_17] : memref<3x8xf32, #tpu.memory_space<vmem>>, vector<3x8xf32>
    tpu.vector_store %arg6[%c0_16, %c0_17], %34 {strides = array<i32>} : memref<3x8xf32, #tpu.memory_space<vmem>>, vector<3x8xf32>,
    return
  }
  func.func @transform_0(%arg0: i32) -> (i32, i32) {
    %c0_i32 = arith.constant 0 : i32
    %c0_i32_0 = arith.constant 0 : i32
    return %c0_i32, %arg0 : i32, i32
  }
  func.func @transform_1(%arg0: i32) -> (i32, i32) {
    %c0_i32 = arith.constant 0 : i32
    %c0_i32_0 = arith.constant 0 : i32
    %c0_i32_1 = arith.constant 0 : i32
    return %c0_i32, %c0_i32_0 : i32, i32
  }
  func.func @transform_2(%arg0: i32) -> (i32, i32) {
    %c0_i32 = arith.constant 0 : i32
    %c0_i32_0 = arith.constant 0 : i32
    %c0_i32_1 = arith.constant 0 : i32
    return %c0_i32, %c0_i32_0 : i32, i32
  }
  func.func @transform_3(%arg0: i32) -> (i32, i32) {
    %c0_i32 = arith.constant 0 : i32
    %c0_i32_0 = arith.constant 0 : i32
    %c0_i32_1 = arith.constant 0 : i32
    return %c0_i32, %c0_i32_0 : i32, i32
  }
  func.func @transform_4(%arg0: i32) -> (i32, i32) {
    %c0_i32 = arith.constant 0 : i32
    %c0_i32_0 = arith.constant 0 : i32
    %c0_i32_1 = arith.constant 0 : i32
    return %c0_i32, %c0_i32_0 : i32, i32
  }
  func.func @transform_5(%arg0: i32) -> (i32, i32) {
    %c0_i32 = arith.constant 0 : i32
    %c0_i32_0 = arith.constant 0 : i32
    return %c0_i32, %arg0 : i32, i32
  }
}

</mosaic_0001>

<bundles_post_ra>
// kernel: mlp_forward_t.1
= control target key start
LH: loop header
LB: loop body
LE: loop exit
PB: predicated region body
PF: predicated region fallthrough
CT: control target
= control target key end

     0   :  { %vm43_vm0 = vcmask 1043456   ;;  %vm36_vm1 = vcmask 31744   ;;  %v400_v4 = vmov 0   ;;  %s474_s0 = inlined_call_operand.vmem [shape: f32[4,8], index: 0, kind: input, shape index: {}]   ;;  %s475_s1 = inlined_call_operand.vmem [shape: f32[10,4], index: 1, kind: input, shape index: {}]   ;;  %s476_s2 = inlined_call_operand.vmem [shape: f32[8,10], index: 2, kind: input, shape index: {}]   ;;  %s477_s3 = inlined_call_operand.vmem [shape: f32[3,8], index: 3, kind: input, shape index: {}]   ;;  %s478_s4 = inlined_call_operand.vmem [shape: f32[10,3], index: 4, kind: input, shape index: {}]   ;;  %s479_s5 = inlined_call_operand.hbm [shape: f32[3,8], index: 5, kind: output, shape index: {}]  }
   0x1   :  { %v21_v0 = vld [vmem:[%s474_s0] sm:$0xf]  ;;  %v25_v2 = vld [vmem:[%s475_s1 + $0x8] sm:$0x3]  ;;  %368 = vset.pattern.permute.xlu0 %v400_v4 }
   0x2   :  { %v24_v1 = vld [vmem:[%s475_s1] sm:$0xff]  ;;  %339 = vmatprep.subr.msk.mxu0 %vm43_vm0, %v21_v0 }
   0x3   :  { %341 = vmatprep.mubr.msk.f32.mxu0 %vm36_vm1, %v24_v1  ;;  %v22_v3 = vld [vmem:[%s478_s4] sm:$0xff]  ;;  %340 = vmatpush3.msk.msra.mxu0 %vm43_vm0, %v21_v0 }
   0x4   :  { %10 = vsyncpa [#allocation3], 0  ;;  %342 = vmatmul.mubr.msk.f32.vlgmr.msra.gmra.mrb[0].mxu0 %vm36_vm1, %v25_v2  ;;  %28 = vperm.xlu0 %368, %v22_v3   ;;  %v23_v5 = vld [vmem:[%s478_s4 + $0x8] sm:$0x3]  ;;  %v401_v6 = vmov 0.0|0.0   ;;  %vm402_vm2 = vmmov 0  }
   0x5   :  { %356 = vmatprep.subr.bf16.mxu1 %v401_v6  ;;  %v403_v7 = vmov 0.0   ;;  %v404_v8 = vmov 1   ;;  %vm133_vm3 = vcmask 1041408   ;;  %vm405_vm4 = vmmov 1   ;;  %v124_v18 = vld [vmem:[%s476_s2] sm:$0xff]  ;;  %s407_s2 = smov [#allocation2]  }
   0x6   :  { %348 = vmatprep.mubr.msk.f32.mxu1 %vm402_vm2, %v403_v7  ;;  %351 = vmatprep.subr.mxu0 %v403_v7  ;;  %vm358_vm5 = vmpackc.low %vm133_vm3, %vm405_vm4  ;;  %vm129_vm6 = vcmask 80896   ;;  %v406_v19 = vmov 2   ;;  %v208_v25 = vld [vmem:[%s477_s3] sm:$0x7]  ;;  %vm213_vm7 = vcmask 64512   ;;  %vm287_vm8 = vcmask 59392  }
   0x7   :  { %353 = vmatprep.mubr.msk.f32.mxu0 %vm402_vm2, %v403_v7  ;;  %369 = vset.pattern.permute.xlu1 %v404_v8  ;;  %s317_s3 = sshll.u32 %s407_s2, 4  ;;  %s318_s3 = int_to_ptr.vmem [resolvable:$true] %s317_s3 }
   0x8   :  { %33 = vperm.xlu0 %368, %v23_v5   ;;  %126 = vperm.xlu1 %369, %v22_v3   ;;  %s376_s29 = scalar_lea.vmem %s318_s3, 64  ;;  %p381_p1 = scmp.lt.s32.totalorder %s318_s3, %s318_s3 }
   0x9   :  { %p377_p0 = scmp.ne.s32.totalorder %s318_s3, %s376_s29  ;;  %p382_p2 = scmp.lt.s32.totalorder %s376_s29, %s376_s29 }
   0xb   :  { %p383_p3 = por %p382_p2, %p381_p1 }
   0xc   :  { %370 = vset.pattern.permute.xlu1 %v406_v19  ;;  %371 = vset.pattern.permute.xlu0 %v406_v19 }
   0xd   :  { %210 = vperm.xlu1 %370, %v22_v3   ;;  %p384_p4 = pnand %p383_p3, %p377_p0 }
  0x83   :  { %v29_v9 = vpop.permute.xlu0 %28 }
  0x87   :  { %v34_v10 = vpop.permute.xlu0 %33  ;;  %v127_v20 = vpop.permute.xlu1 %126 }
  0x8c   :  { %v211_v26 = vpop.permute.xlu1 %210 }
  0xd7   :  { %v343_v11 = vpop.f32.mrb[0].mxu0 }
  0xd8   :  { %v119_v12 = vadd.f32 %v343_v11, %v34_v10  ;;  %v113_v13 = vpop.f32.mrb[1].mxu0 }
  0xd9   :  { %v114_v14 = vadd.f32 %v113_v13, %v29_v9 }
  0xda   :  { %v123_v15 = vmax.f32 %v119_v12, 0.0 }
  0xdb   :  { %v122_v16 = vmax.f32 %v114_v14, 0.0 }
  0xdd   :  { %v357_v17 = vpack.c.bf16 %v123_v15, %v122_v16 }
  0xdf   :  { %359 = vmatpush3.bf16.msk.msra.mxu1 %vm358_vm5, %v357_v17 }
  0xe2   :  { %349 = vmatmul.mubr.msk.f32.vlgmr.msra.gmra.mrb[0].mxu1 %vm129_vm6, %v124_v18 }
 0x1b5   :  { %v203_v21 = vpop.f32.mrb[0].mxu1 }
 0x1b6   :  { %v204_v22 = vadd.f32 %v203_v21, %v127_v20  ;;  %v350_v23 = vpop.f32.mrb[1].mxu1 }
 0x1b8   :  { %v207_v24 = vmax.f32 %v204_v22, 0.0 }
 0x1ba   :  { %352 = vmatpush3.msra.mxu0 %v207_v24 }
 0x1bb   :  { %354 = vmatmul.mubr.msk.f32.vlgmr.msra.gmra.mrb[2].mxu0 %vm213_vm7, %v208_v25 }
 0x28e   :  { %v283_v27 = vpop.f32.mrb[2].mxu0 }
 0x28f   :  { %v284_v28 = vadd.f32 %v283_v27, %v211_v26  ;;  %v355_v29 = vpop.f32.mrb[3].mxu0 }
 0x291   :  { %v288_v30 = vsel %vm287_vm8, %v284_v28, -inf }
 0x292   :  { %v289_v31 = vrot.slane %v288_v30, 4 }
 0x294   :  { %v290_v32 = vmax.f32 %v288_v30, %v289_v31 }
 0x296   :  { %v291_v33 = vrot.slane %v290_v32, 2 }
 0x298   :  { %v292_v34 = vmax.f32 %v290_v32, %v291_v33 }
 0x29a   :  { %v293_v35 = vrot.slane %v292_v34, 1 }
 0x29c   :  { %v294_v36 = vmax.f32 %v292_v34, %v293_v35 }
 0x29e   :  { %v295_v37 = vsub.f32 %v284_v28, %v294_v36 }
 0x2a0   :  { %v296_v38 = vmul.f32 1.442695, %v295_v37 }
 0x2a2   :  { %372 = vpow2.f32 %v296_v38 }
 0x2ac   :  { %v373_v39 = vpop.eup %372 }
 0x2ad   :  { %v298_v40 = vsel %vm287_vm8, %v373_v39, 0.0 }
 0x2ae   :  { %v299_v41 = vrot.slane %v298_v40, 4 }
 0x2b0   :  { %v300_v42 = vadd.f32 %v299_v41, %v298_v40 }
 0x2b2   :  { %v301_v43 = vrot.slane %v300_v42, 2 }
 0x2b4   :  { %v302_v44 = vadd.f32 %v301_v43, %v300_v42 }
 0x2b6   :  { %v303_v45 = vrot.slane %v302_v44, 1 }
 0x2b8   :  { %v304_v46 = vadd.f32 %v303_v45, %v302_v44 }
 0x2ba   :  { %374 = vrcp.f32 %v304_v46 }
 0x2c4   :  { %v375_v47 = vpop.eup %374 }
 0x2c5   :  { %v306_v48 = vmul.f32 %v375_v47, %v304_v46 }
 0x2c7   :  { %v307_v49 = vsub.f32 2.0, %v306_v48 }
 0x2c9   :  { %v308_v50 = vmul.f32 %v375_v47, %v307_v49 }
 0x2cb   :  { %v309_v51 = vmul.f32 %v373_v39, %v308_v50 }
 0x2cd   :  { %310 = vst.msk [vmem:[#allocation2] sm:$0x7] %vm287_vm8, %v309_v51 }
 0x2ce   :  { %387 = shalt.err (!%p384_p4)
}
 0x2cf   :  { %s388_s7 = scalar_lea.hbm %s479_s5, 64 }
 0x2d0   :  { %p389_p5 = scmp.ne.s32.totalorder %s479_s5, %s388_s7  ;;  %p392_p6 = scmp.lt.u32.totalorder %s388_s7, %s479_s5 }
 0x2d2   :  { %p394_p7 = pnand %p392_p6, %p389_p5 }
 0x2d4   :  { %397 = shalt.err (!%p394_p7)
}
 0x2d5   :  { %320 = dma.vmem_to_hbm [thread:$0]  %s318_s3, 64, %s479_s5, [#allocation3]  }
 0x2d6   :  { %398 = dma.done.wait [#allocation3], 64  }
 0x2d7   :  { %399 = vsyncadd [#allocation3], 4294967232 }
 0x2d8   :  { %324 = vsyncpa [#allocation3], 1 }

</bundles_post_ra>
